<compile_context>
chip_gen: v6e
topology: v6e:2x2x1
jax: 0.10.0
libtpu: 0.0.40
codegen_flags: <defaults>
</compile_context>

<pallas_src>
import functools

import numpy as np
import jax
import jax.numpy as jnp
from jax.experimental import pallas as pl
from jax.experimental.pallas import tpu as pltpu


def _gat_net_kernel(x_ref, adj_ref, w1_ref, a1_ref, b1_ref,
                    w2_ref, a2_ref, b2_ref, out_ref, *, heads, hid_c, out_c):
    """Fused 2-layer GAT forward on the full (small) graph, resident in VMEM."""
    neg_slope = jnp.float32(0.2)
    neg_inf = jnp.float32(-1e30)

    x = x_ref[...]                      # (N, Fin)
    adj_pos = adj_ref[...] > 0          # (N, N) mask, adj[i, j]: edge j -> i

    def gat_attention(feat, alpha, n_heads, f_per_head):
        """feat: (N, n_heads*f_per_head); alpha: (N, 2*n_heads)
        alpha[:, :n_heads] = per-head source scores, [:, n_heads:] = dest."""
        alpha_t = alpha.T               # (2*n_heads, N), one XLU transpose
        outs = []
        for hd in range(n_heads):       # static unroll (n_heads is tiny)
            src_row = alpha_t[hd:hd + 1, :]                         # (1, N)
            dst_col = alpha[:, n_heads + hd:n_heads + hd + 1]       # (N, 1)
            # e[i, j] = LeakyReLU(alpha_dst[i] + alpha_src[j])
            e = dst_col + src_row                                    # (N, N)
            e = jnp.where(e > 0, e, neg_slope * e)
            # Single mask application; exp of (-1e30 - rowmax) underflows to 0.
            e = jnp.where(adj_pos, e, neg_inf)
            e = e - jnp.max(e, axis=1, keepdims=True)
            p = jnp.exp(e)
            inv = pl.reciprocal(jnp.sum(p, axis=1, keepdims=True), approx=True)
            att = p * inv                                            # (N, N)
            outs.append(jnp.dot(
                att, feat[:, hd * f_per_head:(hd + 1) * f_per_head],
                preferred_element_type=jnp.float32))                 # (N, F)
        return outs[0] if n_heads == 1 else jnp.concatenate(outs, axis=1)

    # ---------------- Layer 1: GATConv(in_c, hid_c, heads) + ELU ----------
    h = jnp.dot(x, w1_ref[...], preferred_element_type=jnp.float32)       # (N, H*F1)
    alpha1 = jnp.dot(h, a1_ref[...], preferred_element_type=jnp.float32)  # (N, 2H)
    h1 = gat_attention(h, alpha1, heads, hid_c) + b1_ref[...]             # (N, H*F1)
    h1 = jnp.where(h1 > 0, h1, jnp.exp(jnp.minimum(h1, 0.0)) - 1.0)       # ELU
    # nn.Dropout(0.5): identity in eval mode (deterministic forward).

    # ---------------- Layer 2: GATConv(hid_c*heads, out_c, heads=1) -------
    g = jnp.dot(h1, w2_ref[...], preferred_element_type=jnp.float32)      # (N, out_c)
    alpha2 = jnp.dot(g, a2_ref[...], preferred_element_type=jnp.float32)  # (N, 2)
    o2 = gat_attention(g, alpha2, 1, out_c) + b2_ref[...]                  # (N, out_c)

    out_ref[...] = o2.astype(out_ref.dtype)   # single lane-dense store


def _block_diag_alpha_proj(att_src, att_dst):
    """Fold (H, F) src/dst attention vectors into one (H*F, 2H) projection so
    alpha = h @ A computes every per-head attention scalar in one MXU matmul.
    Column h -> src score of head h; column H + h -> dst score of head h."""
    H, F = att_src.shape
    eye = jnp.eye(H, dtype=jnp.float32)
    src = (att_src[:, :, None] * eye[:, None, :]).reshape(H * F, H)
    dst = (att_dst[:, :, None] * eye[:, None, :]).reshape(H * F, H)
    return jnp.concatenate([src, dst], axis=1)


def build_adj(edge_index, num_nodes):
    """Dense adjacency mask: adj[target, source] = 1, plus self-loops
    (GATConv add_self_loops=True default)."""
    src = edge_index[0]
    dst = edge_index[1]
    adj = jnp.zeros((num_nodes, num_nodes), jnp.float32)
    adj = adj.at[dst, src].set(1.0)
    diag = jnp.arange(num_nodes)
    adj = adj.at[diag, diag].set(1.0)
    return adj


def gat_net_forward(x, edge_index, params, *, hid_c, heads, out_c=2):
    """GATNet.forward: elu(conv1(x, ei)) -> dropout(eval) -> conv2(., ei),
    fused into a single Pallas kernel call."""
    N, in_c = x.shape
    h1_w = heads * hid_c
    adj = build_adj(edge_index, N)
    a1 = _block_diag_alpha_proj(params["asrc1"], params["adst1"])   # (H*F1, 2H)
    a2 = _block_diag_alpha_proj(params["asrc2"], params["adst2"])   # (out_c, 2)

    kernel = functools.partial(_gat_net_kernel, heads=heads, hid_c=hid_c,
                               out_c=out_c)
    return pl.pallas_call(
        kernel,
        out_shape=jax.ShapeDtypeStruct((N, out_c), jnp.float32),
        grid=(1,),
        in_specs=[
            pl.BlockSpec((N, in_c), lambda i: (0, 0)),          # x
            pl.BlockSpec((N, N), lambda i: (0, 0)),             # adj
            pl.BlockSpec((in_c, h1_w), lambda i: (0, 0)),       # w1
            pl.BlockSpec((h1_w, 2 * heads), lambda i: (0, 0)),  # a1 (alpha proj)
            pl.BlockSpec((1, h1_w), lambda i: (0, 0)),          # b1
            pl.BlockSpec((h1_w, out_c), lambda i: (0, 0)),      # w2
            pl.BlockSpec((out_c, 2), lambda i: (0, 0)),         # a2 (alpha proj)
            pl.BlockSpec((1, out_c), lambda i: (0, 0)),         # b2
        ],
        out_specs=pl.BlockSpec((N, out_c), lambda i: (0, 0)),
        compiler_params=pltpu.CompilerParams(
            dimension_semantics=("arbitrary",)),
    )(x, adj, params["w1"], a1, params["b1"], params["w2"], a2, params["b2"])


def init_params(key, in_c, hid_c, heads):
    ks = jax.random.split(key, 8)
    s = 0.1
    return {
        # conv1: GATConv(in_c, hid_c, heads=heads)
        "w1": jax.random.normal(ks[0], (in_c, heads * hid_c), jnp.float32) * s,
        "asrc1": jax.random.normal(ks[1], (heads, hid_c), jnp.float32) * s,
        "adst1": jax.random.normal(ks[2], (heads, hid_c), jnp.float32) * s,
        "b1": jax.random.normal(ks[3], (1, heads * hid_c), jnp.float32) * s,
        # conv2: GATConv(hid_c * heads, 2, heads=1)
        "w2": jax.random.normal(ks[4], (heads * hid_c, 2), jnp.float32) * s,
        "asrc2": jax.random.normal(ks[5], (1, 2), jnp.float32) * s,
        "adst2": jax.random.normal(ks[6], (1, 2), jnp.float32) * s,
        "b2": jax.random.normal(ks[7], (1, 2), jnp.float32) * s,
    }


if __name__ == "__main__":
    N, IN_C, HID_C, HEADS = 16, 8, 8, 2

    key = jax.random.PRNGKey(0)
    k_x, k_p = jax.random.split(key)

    # Node features (data.x analogue).
    x = jax.random.normal(k_x, (N, IN_C), jnp.float32)

    # Deterministic small graph: ring + a few chords (data.edge_index analogue).
    ring_src = np.arange(N)
    ring_dst = (np.arange(N) + 1) % N
    chord_src = np.array([0, 2, 4, 6])
    chord_dst = np.array([8, 10, 12, 14])
    edge_index = jnp.asarray(
        np.stack([np.concatenate([ring_src, chord_src]),
                  np.concatenate([ring_dst, chord_dst])]),
        dtype=jnp.int32)                                   # (2, E)

    params = init_params(k_p, IN_C, HID_C, HEADS)

    fwd = jax.jit(functools.partial(gat_net_forward, hid_c=HID_C, heads=HEADS))
    out = jax.block_until_ready(fwd(x, edge_index, params))

    assert out.shape == (N, 2) and out.dtype == jnp.float32
    assert bool(jnp.all(jnp.isfinite(out)))
    print("KERNEL_OK")
</pallas_src>

<mosaic_0001>
module attributes {stable_mosaic.version = 11 : i64} {
  func.func @_gat_net_kernel(%arg0: i32, %arg1: memref<16x8xf32, #tpu.memory_space<vmem>>, %arg2: memref<16x16xf32, #tpu.memory_space<vmem>>, %arg3: memref<8x16xf32, #tpu.memory_space<vmem>>, %arg4: memref<16x4xf32, #tpu.memory_space<vmem>>, %arg5: memref<1x16xf32, #tpu.memory_space<vmem>>, %arg6: memref<16x2xf32, #tpu.memory_space<vmem>>, %arg7: memref<2x2xf32, #tpu.memory_space<vmem>>, %arg8: memref<1x2xf32, #tpu.memory_space<vmem>>, %arg9: memref<16x2xf32, #tpu.memory_space<vmem>>) attributes {dimension_semantics = [#tpu.dimension_semantics<arbitrary>], iteration_bounds = array<i64: 1>, scalar_prefetch = 0 : i64, scratch_operands = 0 : i64, tpu.core_type = #tpu.core_type<tc>, window_params = [{pipeline_mode = #tpu.pipeline_mode<synchronous>, transform_indices = @transform_0, window_bounds = array<i64: 16, 8>}, {pipeline_mode = #tpu.pipeline_mode<synchronous>, transform_indices = @transform_1, window_bounds = array<i64: 16, 16>}, {pipeline_mode = #tpu.pipeline_mode<synchronous>, transform_indices = @transform_2, window_bounds = array<i64: 8, 16>}, {pipeline_mode = #tpu.pipeline_mode<synchronous>, transform_indices = @transform_3, window_bounds = array<i64: 16, 4>}, {pipeline_mode = #tpu.pipeline_mode<synchronous>, transform_indices = @transform_4, window_bounds = array<i64: 1, 16>}, {pipeline_mode = #tpu.pipeline_mode<synchronous>, transform_indices = @transform_5, window_bounds = array<i64: 16, 2>}, {pipeline_mode = #tpu.pipeline_mode<synchronous>, transform_indices = @transform_6, window_bounds = array<i64: 2, 2>}, {pipeline_mode = #tpu.pipeline_mode<synchronous>, transform_indices = @transform_7, window_bounds = array<i64: 1, 2>}, {pipeline_mode = #tpu.pipeline_mode<synchronous>, transform_indices = @transform_8, window_bounds = array<i64: 16, 2>}]} {
    %c0 = arith.constant 0 : index
    %c0_0 = arith.constant 0 : index
    %0 = vector.load %arg1[%c0, %c0_0] : memref<16x8xf32, #tpu.memory_space<vmem>>, vector<16x8xf32>
    %c0_1 = arith.constant 0 : index
    %c0_2 = arith.constant 0 : index
    %1 = vector.load %arg2[%c0_1, %c0_2] : memref<16x16xf32, #tpu.memory_space<vmem>>, vector<16x16xf32>
    %cst = arith.constant 0.000000e+00 : f32
    %2 = vector.broadcast %cst : f32 to vector<16x16xf32>
    %3 = arith.cmpf ogt, %1, %2 : vector<16x16xf32>
    %c0_3 = arith.constant 0 : index
    %c0_4 = arith.constant 0 : index
    %4 = vector.load %arg3[%c0_3, %c0_4] : memref<8x16xf32, #tpu.memory_space<vmem>>, vector<8x16xf32>
    %cst_5 = arith.constant dense<0.000000e+00> : vector<16x16xf32>
    %5 = tpu.matmul %0, %4, %cst_5 {dimension_numbers = #tpu.dot_dimension_numbers<[1], [0], [0], [1], [0, 0, 1, 1], [], []>} : vector<16x8xf32>, vector<8x16xf32>, vector<16x16xf32> -> vector<16x16xf32>
    %c0_6 = arith.constant 0 : index
    %c0_7 = arith.constant 0 : index
    %6 = vector.load %arg4[%c0_6, %c0_7] : memref<16x4xf32, #tpu.memory_space<vmem>>, vector<16x4xf32>
    %cst_8 = arith.constant dense<0.000000e+00> : vector<16x4xf32>
    %7 = tpu.matmul %5, %6, %cst_8 {dimension_numbers = #tpu.dot_dimension_numbers<[1], [0], [0], [1], [0, 0, 1, 1], [], []>} : vector<16x16xf32>, vector<16x4xf32>, vector<16x4xf32> -> vector<16x4xf32>
    %8 = tpu.transpose %7, [1, 0] : vector<16x4xf32> -> vector<4x16xf32>
    %9 = vector.extract_strided_slice %8 {offsets = [0, 0], sizes = [1, 16], strides = [1, 1]} : vector<4x16xf32> to vector<1x16xf32>
    %10 = vector.extract_strided_slice %7 {offsets = [0, 2], sizes = [16, 1], strides = [1, 1]} : vector<16x4xf32> to vector<16x1xf32>
    %11 = vector.broadcast %10 : vector<16x1xf32> to vector<16x16xf32>
    %12 = vector.broadcast %9 : vector<1x16xf32> to vector<16x16xf32>
    %13 = arith.addf %11, %12 : vector<16x16xf32>
    %cst_9 = arith.constant 0.000000e+00 : f32
    %14 = vector.broadcast %cst_9 : f32 to vector<16x16xf32>
    %15 = arith.cmpf ogt, %13, %14 : vector<16x16xf32>
    %cst_10 = arith.constant 2.000000e-01 : f32
    %16 = vector.broadcast %cst_10 : f32 to vector<16x16xf32>
    %17 = arith.mulf %16, %13 : vector<16x16xf32>
    %18 = arith.select %15, %13, %17 : vector<16x16xi1>, vector<16x16xf32>
    %cst_11 = arith.constant -1.000000e+30 : f32
    %19 = vector.broadcast %cst_11 : f32 to vector<16x16xf32>
    %20 = arith.select %3, %18, %19 : vector<16x16xi1>, vector<16x16xf32>
    %cst_12 = arith.constant dense<0xFF800000> : vector<16xf32>
    %21 = vector.multi_reduction <maximumf>, %20, %cst_12 [1] : vector<16x16xf32> to vector<16xf32>
    %22 = vector.shape_cast %21 : vector<16xf32> to vector<16x1xf32>
    %23 = vector.broadcast %22 : vector<16x1xf32> to vector<16x16xf32>
    %24 = arith.subf %20, %23 : vector<16x16xf32>
    %25 = math.exp %24 : vector<16x16xf32>
    %cst_13 = arith.constant dense<0.000000e+00> : vector<16xf32>
    %26 = vector.multi_reduction <add>, %25, %cst_13 [1] : vector<16x16xf32> to vector<16xf32>
    %27 = vector.shape_cast %26 : vector<16xf32> to vector<16x1xf32>
    %28 = tpu.reciprocal %27 {approx = true} : vector<16x1xf32> -> vector<16x1xf32>
    %29 = vector.broadcast %28 : vector<16x1xf32> to vector<16x16xf32>
    %30 = arith.mulf %25, %29 : vector<16x16xf32>
    %31 = vector.extract_strided_slice %5 {offsets = [0, 0], sizes = [16, 8], strides = [1, 1]} : vector<16x16xf32> to vector<16x8xf32>
    %cst_14 = arith.constant dense<0.000000e+00> : vector<16x8xf32>
    %32 = tpu.matmul %30, %31, %cst_14 {dimension_numbers = #tpu.dot_dimension_numbers<[1], [0], [0], [1], [0, 0, 1, 1], [], []>} : vector<16x16xf32>, vector<16x8xf32>, vector<16x8xf32> -> vector<16x8xf32>
    %33 = vector.extract_strided_slice %8 {offsets = [1, 0], sizes = [1, 16], strides = [1, 1]} : vector<4x16xf32> to vector<1x16xf32>
    %34 = vector.extract_strided_slice %7 {offsets = [0, 3], sizes = [16, 1], strides = [1, 1]} : vector<16x4xf32> to vector<16x1xf32>
    %35 = vector.broadcast %34 : vector<16x1xf32> to vector<16x16xf32>
    %36 = vector.broadcast %33 : vector<1x16xf32> to vector<16x16xf32>
    %37 = arith.addf %35, %36 : vector<16x16xf32>
    %cst_15 = arith.constant 0.000000e+00 : f32
    %38 = vector.broadcast %cst_15 : f32 to vector<16x16xf32>
    %39 = arith.cmpf ogt, %37, %38 : vector<16x16xf32>
    %cst_16 = arith.constant 2.000000e-01 : f32
    %40 = vector.broadcast %cst_16 : f32 to vector<16x16xf32>
    %41 = arith.mulf %40, %37 : vector<16x16xf32>
    %42 = arith.select %39, %37, %41 : vector<16x16xi1>, vector<16x16xf32>
    %cst_17 = arith.constant -1.000000e+30 : f32
    %43 = vector.broadcast %cst_17 : f32 to vector<16x16xf32>
    %44 = arith.select %3, %42, %43 : vector<16x16xi1>, vector<16x16xf32>
    %cst_18 = arith.constant dense<0xFF800000> : vector<16xf32>
    %45 = vector.multi_reduction <maximumf>, %44, %cst_18 [1] : vector<16x16xf32> to vector<16xf32>
    %46 = vector.shape_cast %45 : vector<16xf32> to vector<16x1xf32>
    %47 = vector.broadcast %46 : vector<16x1xf32> to vector<16x16xf32>
    %48 = arith.subf %44, %47 : vector<16x16xf32>
    %49 = math.exp %48 : vector<16x16xf32>
    %cst_19 = arith.constant dense<0.000000e+00> : vector<16xf32>
    %50 = vector.multi_reduction <add>, %49, %cst_19 [1] : vector<16x16xf32> to vector<16xf32>
    %51 = vector.shape_cast %50 : vector<16xf32> to vector<16x1xf32>
    %52 = tpu.reciprocal %51 {approx = true} : vector<16x1xf32> -> vector<16x1xf32>
    %53 = vector.broadcast %52 : vector<16x1xf32> to vector<16x16xf32>
    %54 = arith.mulf %49, %53 : vector<16x16xf32>
    %55 = vector.extract_strided_slice %5 {offsets = [0, 8], sizes = [16, 8], strides = [1, 1]} : vector<16x16xf32> to vector<16x8xf32>
    %cst_20 = arith.constant dense<0.000000e+00> : vector<16x8xf32>
    %56 = tpu.matmul %54, %55, %cst_20 {dimension_numbers = #tpu.dot_dimension_numbers<[1], [0], [0], [1], [0, 0, 1, 1], [], []>} : vector<16x16xf32>, vector<16x8xf32>, vector<16x8xf32> -> vector<16x8xf32>
    %57 = tpu.concatenate %32, %56 in 1 : vector<16x8xf32>, vector<16x8xf32> -> vector<16x16xf32>
    %c0_21 = arith.constant 0 : index
    %c0_22 = arith.constant 0 : index
    %58 = vector.load %arg5[%c0_21, %c0_22] : memref<1x16xf32, #tpu.memory_space<vmem>>, vector<1x16xf32>
    %59 = vector.broadcast %58 : vector<1x16xf32> to vector<16x16xf32>
    %60 = arith.addf %57, %59 : vector<16x16xf32>
    %cst_23 = arith.constant 0.000000e+00 : f32
    %61 = vector.broadcast %cst_23 : f32 to vector<16x16xf32>
    %62 = arith.cmpf ogt, %60, %61 : vector<16x16xf32>
    %cst_24 = arith.constant 0.000000e+00 : f32
    %63 = vector.broadcast %cst_24 : f32 to vector<16x16xf32>
    %64 = arith.minimumf %60, %63 : vector<16x16xf32>
    %65 = math.exp %64 : vector<16x16xf32>
    %cst_25 = arith.constant 1.000000e+00 : f32
    %66 = vector.broadcast %cst_25 : f32 to vector<16x16xf32>
    %67 = arith.subf %65, %66 : vector<16x16xf32>
    %68 = arith.select %62, %60, %67 : vector<16x16xi1>, vector<16x16xf32>
    %c0_26 = arith.constant 0 : index
    %c0_27 = arith.constant 0 : index
    %69 = vector.load %arg6[%c0_26, %c0_27] : memref<16x2xf32, #tpu.memory_space<vmem>>, vector<16x2xf32>
    %cst_28 = arith.constant dense<0.000000e+00> : vector<16x2xf32>
    %70 = tpu.matmul %68, %69, %cst_28 {dimension_numbers = #tpu.dot_dimension_numbers<[1], [0], [0], [1], [0, 0, 1, 1], [], []>} : vector<16x16xf32>, vector<16x2xf32>, vector<16x2xf32> -> vector<16x2xf32>
    %c0_29 = arith.constant 0 : index
    %c0_30 = arith.constant 0 : index
    %71 = vector.load %arg7[%c0_29, %c0_30] : memref<2x2xf32, #tpu.memory_space<vmem>>, vector<2x2xf32>
    %cst_31 = arith.constant dense<0.000000e+00> : vector<16x2xf32>
    %72 = tpu.matmul %70, %71, %cst_31 {dimension_numbers = #tpu.dot_dimension_numbers<[1], [0], [0], [1], [0, 0, 1, 1], [], []>} : vector<16x2xf32>, vector<2x2xf32>, vector<16x2xf32> -> vector<16x2xf32>
    %73 = tpu.transpose %72, [1, 0] : vector<16x2xf32> -> vector<2x16xf32>
    %74 = vector.extract_strided_slice %73 {offsets = [0, 0], sizes = [1, 16], strides = [1, 1]} : vector<2x16xf32> to vector<1x16xf32>
    %75 = vector.extract_strided_slice %72 {offsets = [0, 1], sizes = [16, 1], strides = [1, 1]} : vector<16x2xf32> to vector<16x1xf32>
    %76 = vector.broadcast %75 : vector<16x1xf32> to vector<16x16xf32>
    %77 = vector.broadcast %74 : vector<1x16xf32> to vector<16x16xf32>
    %78 = arith.addf %76, %77 : vector<16x16xf32>
    %cst_32 = arith.constant 0.000000e+00 : f32
    %79 = vector.broadcast %cst_32 : f32 to vector<16x16xf32>
    %80 = arith.cmpf ogt, %78, %79 : vector<16x16xf32>
    %cst_33 = arith.constant 2.000000e-01 : f32
    %81 = vector.broadcast %cst_33 : f32 to vector<16x16xf32>
    %82 = arith.mulf %81, %78 : vector<16x16xf32>
    %83 = arith.select %80, %78, %82 : vector<16x16xi1>, vector<16x16xf32>
    %cst_34 = arith.constant -1.000000e+30 : f32
    %84 = vector.broadcast %cst_34 : f32 to vector<16x16xf32>
    %85 = arith.select %3, %83, %84 : vector<16x16xi1>, vector<16x16xf32>
    %cst_35 = arith.constant dense<0xFF800000> : vector<16xf32>
    %86 = vector.multi_reduction <maximumf>, %85, %cst_35 [1] : vector<16x16xf32> to vector<16xf32>
    %87 = vector.shape_cast %86 : vector<16xf32> to vector<16x1xf32>
    %88 = vector.broadcast %87 : vector<16x1xf32> to vector<16x16xf32>
    %89 = arith.subf %85, %88 : vector<16x16xf32>
    %90 = math.exp %89 : vector<16x16xf32>
    %cst_36 = arith.constant dense<0.000000e+00> : vector<16xf32>
    %91 = vector.multi_reduction <add>, %90, %cst_36 [1] : vector<16x16xf32> to vector<16xf32>
    %92 = vector.shape_cast %91 : vector<16xf32> to vector<16x1xf32>
    %93 = tpu.reciprocal %92 {approx = true} : vector<16x1xf32> -> vector<16x1xf32>
    %94 = vector.broadcast %93 : vector<16x1xf32> to vector<16x16xf32>
    %95 = arith.mulf %90, %94 : vector<16x16xf32>
    %cst_37 = arith.constant dense<0.000000e+00> : vector<16x2xf32>
    %96 = tpu.matmul %95, %70, %cst_37 {dimension_numbers = #tpu.dot_dimension_numbers<[1], [0], [0], [1], [0, 0, 1, 1], [], []>} : vector<16x16xf32>, vector<16x2xf32>, vector<16x2xf32> -> vector<16x2xf32>
    %c0_38 = arith.constant 0 : index
    %c0_39 = arith.constant 0 : index
    %97 = vector.load %arg8[%c0_38, %c0_39] : memref<1x2xf32, #tpu.memory_space<vmem>>, vector<1x2xf32>
    %98 = vector.broadcast %97 : vector<1x2xf32> to vector<16x2xf32>
    %99 = arith.addf %96, %98 : vector<16x2xf32>
    %c0_40 = arith.constant 0 : index
    %c0_41 = arith.constant 0 : index
    %100 = vector.load %arg9[%c0_40, %c0_41] : memref<16x2xf32, #tpu.memory_space<vmem>>, vector<16x2xf32>
    tpu.vector_store %arg9[%c0_40, %c0_41], %99 {strides = array<i32>} : memref<16x2xf32, #tpu.memory_space<vmem>>, vector<16x2xf32>,
    return
  }
  func.func @transform_0(%arg0: i32) -> (i32, i32) {
    %c0_i32 = arith.constant 0 : i32
    %c0_i32_0 = arith.constant 0 : i32
    %c0_i32_1 = arith.constant 0 : i32
    return %c0_i32, %c0_i32_0 : i32, i32
  }
  func.func @transform_1(%arg0: i32) -> (i32, i32) {
    %c0_i32 = arith.constant 0 : i32
    %c0_i32_0 = arith.constant 0 : i32
    %c0_i32_1 = arith.constant 0 : i32
    return %c0_i32, %c0_i32_0 : i32, i32
  }
  func.func @transform_2(%arg0: i32) -> (i32, i32) {
    %c0_i32 = arith.constant 0 : i32
    %c0_i32_0 = arith.constant 0 : i32
    %c0_i32_1 = arith.constant 0 : i32
    return %c0_i32, %c0_i32_0 : i32, i32
  }
  func.func @transform_3(%arg0: i32) -> (i32, i32) {
    %c0_i32 = arith.constant 0 : i32
    %c0_i32_0 = arith.constant 0 : i32
    %c0_i32_1 = arith.constant 0 : i32
    return %c0_i32, %c0_i32_0 : i32, i32
  }
  func.func @transform_4(%arg0: i32) -> (i32, i32) {
    %c0_i32 = arith.constant 0 : i32
    %c0_i32_0 = arith.constant 0 : i32
    %c0_i32_1 = arith.constant 0 : i32
    return %c0_i32, %c0_i32_0 : i32, i32
  }
  func.func @transform_5(%arg0: i32) -> (i32, i32) {
    %c0_i32 = arith.constant 0 : i32
    %c0_i32_0 = arith.constant 0 : i32
    %c0_i32_1 = arith.constant 0 : i32
    return %c0_i32, %c0_i32_0 : i32, i32
  }
  func.func @transform_6(%arg0: i32) -> (i32, i32) {
    %c0_i32 = arith.constant 0 : i32
    %c0_i32_0 = arith.constant 0 : i32
    %c0_i32_1 = arith.constant 0 : i32
    return %c0_i32, %c0_i32_0 : i32, i32
  }
  func.func @transform_7(%arg0: i32) -> (i32, i32) {
    %c0_i32 = arith.constant 0 : i32
    %c0_i32_0 = arith.constant 0 : i32
    %c0_i32_1 = arith.constant 0 : i32
    return %c0_i32, %c0_i32_0 : i32, i32
  }
  func.func @transform_8(%arg0: i32) -> (i32, i32) {
    %c0_i32 = arith.constant 0 : i32
    %c0_i32_0 = arith.constant 0 : i32
    %c0_i32_1 = arith.constant 0 : i32
    return %c0_i32, %c0_i32_0 : i32, i32
  }
}

</mosaic_0001>

<bundles_post_ra>
// kernel: gat_net_forward.1
= control target key start
LH: loop header
LB: loop body
LE: loop exit
PB: predicated region body
PF: predicated region fallthrough
CT: control target
= control target key end

     0   :  { %vm36_vm0 = vcmask 64512   ;;  %vm120_vm1 = vcmask 130048   ;;  %v994_v7 = vmov 3   ;;  %v995_v10 = vmov 2   ;;  %s997_s20 = smov 8   ;;  %s1148_s2 = inlined_call_operand.vmem [shape: f32[8,16], index: 2, kind: input, shape index: {}]   ;;  %s1149_s0 = inlined_call_operand.vmem [shape: f32[16,8], index: 0, kind: input, shape index: {}]   ;;  %s1150_s3 = inlined_call_operand.vmem [shape: f32[16,4], index: 3, kind: input, shape index: {}]   ;;  %s1151_s1 = inlined_call_operand.vmem [shape: f32[16,16], index: 1, kind: input, shape index: {}]   ;;  %s1152_s5 = inlined_call_operand.vmem [shape: f32[16,2], index: 5, kind: input, shape index: {}]   ;;  %s1153_s6 = inlined_call_operand.vmem [shape: f32[2,2], index: 6, kind: input, shape index: {}]   ;;  %s1154_s4 = inlined_call_operand.vmem [shape: f32[1,16], index: 4, kind: input, shape index: {}]   ;;  %s1155_s7 = inlined_call_operand.vmem [shape: f32[1,2], index: 7, kind: input, shape index: {}]   ;;  %s1156_s8 = inlined_call_operand.vmem [shape: f32[16,2], index: 8, kind: output, shape index: {}]  }
   0x1   :  { %v35_v0 = vld [vmem:[%s1148_s2] sm:$0xff]  ;;  %v30_v2 = vld [vmem:[%s1149_s0 + $0x8] sm:$0xff]  ;;  %961 = vset.pattern.permute.xlu0 %v994_v7  ;;  %v244_v11 = vlaneseq  ;;  %vm614_vm8 = vcmask 1041408   ;;  %vm607_vm11 = vcmask 15360  }
   0x2   :  { %v29_v1 = vld [vmem:[%s1149_s0] sm:$0xff]  ;;  %910 = vmatprep.subr.mxu0 %v35_v0  ;;  %v119_v3 = vld [vmem:[%s1150_s3 + $0x8] sm:$0xff] }
   0x3   :  { %912 = vmatprep.mubr.msk.f32.mxu0 %vm36_vm0, %v29_v1  ;;  %911 = vmatpush3.msra.mxu0 %v35_v0  ;;  %v118_v4 = vld [vmem:[%s1150_s3] sm:$0xff]  ;;  %v1068_v12 = vshrl.u32 %v244_v11, 7  ;;  %v1080_v21 = vld [vmem:[%s1151_s1 + $0x8] sm:$0xff] }
   0x4   :  { %913 = vmatmul.mubr.msk.f32.vlgmr.msra.gmra.mxu0 %vm36_vm0, %v30_v2  ;;  %915 = vmatprep.subr.mxu1 %v119_v3  ;;  %v1074_v17 = vld [vmem:[%s1151_s1] sm:$0xff]  ;;  %vm34_vm4 = vcmp.gt.f32.partialorder %v1080_v21, 0.0  ;;  %s996_s1 = smov 120  }
   0x5   :  { %916 = vmatpush3.msra.mxu1 %v119_v3  ;;  %v371_v13 = vsub.s32 1, %v1068_v12  ;;  %v246_v18 = vsub.s32 0, %v1068_v12  ;;  %vm33_vm2 = vcmp.gt.f32.partialorder %v1074_v17, 0.0 }
   0x6   :  { %917 = vmatprep.subr.mxu1 %v118_v4 }
   0x7   :  { %918 = vmatpush3.msra.mxu1 %v118_v4 }
  0xc4   :  { %v1061_v5 = vpop.f32.mrf.mxu0 }
  0xc5   :  { %922 = vmatprep.subr.mxu0 %v1061_v5 }
  0xc6   :  { %v109_v6 = vpop.f32.mrf.mxu0  ;;  %923 = vmatpush3.msra.mxu0 %v1061_v5 }
  0xc7   :  { %919 = vmatprep.mubr.msk.f32.mxu1 %vm120_vm1, %v109_v6  ;;  %924 = vmatprep.subr.mxu0 %v109_v6 }
  0xc8   :  { %920 = vmatmul.mubr.msk.f32.vlgmr.msra.gmra.mxu1 %vm120_vm1, %v1061_v5  ;;  %925 = vmatpush3.msra.mxu0 %v109_v6 }
 0x188   :  { %v921_v8 = vpop.f32.mrf.mxu1 }
 0x18a   :  { %v193_v9 = vpop.f32.mrf.mxu1 }
 0x18b   :  { %202 = vxpose.xlu1.b32.start [1/2] (short) (narrow) %v193_v9, 8  ;;  %362 = vperm.xlu0 %961, %v193_v9  }
 0x18f   :  { %203 = vxpose.xlu1.b32.end [2/2] (short) (narrow) %v921_v8, 8  ;;  %366 = vperm.xlu0 %961, %v921_v8  }
 0x193   :  { %962 = vset.pattern.permute.xlu0 %v995_v10 }
 0x194   :  { %236 = vperm.xlu0 %962, %v193_v9  }
 0x1ad   :  { %963 = vset.pattern.permute.xlu1 %v995_v10 }
 0x1ae   :  { %241 = vperm.xlu1 %963, %v921_v8  }
 0x206   :  { %v363_v14 = vpop.permute.xlu0 %362 }
 0x207   :  { %v218_v15 = vpop.trf.xlu1 }
 0x208   :  { %v372_v16 = vrot.slane %v218_v15, %v371_v13  ;;  %v247_v25 = vrot.slane %v218_v15, %v246_v18  ;;  %v524_v15 = vld [vmem:[%s1152_s5 + $0x8] sm:$0xff] }
 0x209   :  { %936 = vmatprep.subr.mxu0 %v524_v15 }
 0x20a   :  { %v373_v19 = vadd.f32 %v372_v16, %v363_v14  ;;  %v367_v20 = vpop.permute.xlu0 %366 }
 0x20b   :  { %v374_v22 = vadd.f32 %v372_v16, %v367_v20  ;;  %v523_v16 = vld [vmem:[%s1152_s5] sm:$0xff] }
 0x20c   :  { %vm375_vm3 = vcmp.gt.f32.partialorder %v373_v19, 0.0  ;;  %v377_v23 = vmul.f32 0.2, %v373_v19 }
 0x20d   :  { %v378_v24 = vmul.f32 0.2, %v374_v22  ;;  %vm376_vm5 = vcmp.gt.f32.partialorder %v374_v22, 0.0 }
 0x20e   :  { %v379_v26 = vsel %vm375_vm3, %v373_v19, %v377_v23 }
 0x20f   :  { %v237_v27 = vpop.permute.xlu0 %236  ;;  %v381_v28 = vsel %vm33_vm2, %v379_v26, -1e+30  ;;  %v380_v29 = vsel %vm376_vm5, %v374_v22, %v378_v24  ;;  %v606_v22 = vld [vmem:[%s1153_s6] sm:$0x3] }
 0x210   :  { %v248_v30 = vadd.f32 %v247_v25, %v237_v27  ;;  %v383_v31 = vsel %vm120_vm1, %v381_v28, -inf  ;;  %v382_v32 = vsel %vm34_vm4, %v380_v29, -1e+30  ;;  %v873_v24 = vld [vmem:[%s1154_s4] ss:$0 sm:$0xff] }
 0x211   :  { %384 = vmax.xlane.f32.xlu0 %v383_v31  ;;  %v386_v33 = vsel %vm120_vm1, %v382_v32, -inf }
 0x212   :  { %v252_v34 = vmul.f32 0.2, %v248_v30  ;;  %387 = vmax.xlane.f32.xlu1 %v386_v33  ;;  %vm250_vm6 = vcmp.gt.f32.partialorder %v248_v30, 0.0 }
 0x214   :  { %v254_v35 = vsel %vm250_vm6, %v248_v30, %v252_v34 }
 0x215   :  { %v256_v36 = vsel %vm33_vm2, %v254_v35, -1e+30 }
 0x216   :  { %v258_v37 = vsel %vm120_vm1, %v256_v36, -inf }
 0x217   :  { %259 = vmax.xlane.f32.xlu0 %v258_v37 }
 0x223   :  { %405 = vrot.lane.b32.xlu1 %v109_v6, %s996_s1 }
 0x229   :  { %v242_v38 = vpop.permute.xlu1 %241 }
 0x22a   :  { %v249_v39 = vadd.f32 %v247_v25, %v242_v38 }
 0x22c   :  { %v253_v40 = vmul.f32 0.2, %v249_v39  ;;  %vm251_vm7 = vcmp.gt.f32.partialorder %v249_v39, 0.0 }
 0x22e   :  { %v255_v41 = vsel %vm251_vm7, %v249_v39, %v253_v40 }
 0x22f   :  { %v257_v42 = vsel %vm34_vm4, %v255_v41, -1e+30 }
 0x230   :  { %v261_v43 = vsel %vm120_vm1, %v257_v42, -inf }
 0x231   :  { %262 = vmax.xlane.f32.xlu0 %v261_v43 }
 0x29a   :  { %v385_v44 = vpop.xlane.xlu0 %384 }
 0x29b   :  { %v389_v45 = vsub.f32 %v381_v28, %v385_v44  ;;  %v388_v46 = vpop.xlane.xlu1 %387 }
 0x29c   :  { %v390_v47 = vsub.f32 %v382_v32, %v388_v46 }
 0x29d   :  { %v391_v48 = vmul.f32 1.442695, %v389_v45 }
 0x29e   :  { %v393_v49 = vmul.f32 1.442695, %v390_v47 }
 0x29f   :  { %v406_v3 = vpop.permute.xlu1 %405 }
 0x2a0   :  { %966 = vpow2.f32 %v393_v49  ;;  %v260_v54 = vpop.xlane.xlu0 %259 }
 0x2a1   :  { %968 = vpow2.f32 %v391_v48  ;;  %v264_v60 = vsub.f32 %v256_v36, %v260_v54 }
 0x2a3   :  { %v266_v61 = vmul.f32 1.442695, %v264_v60 }
 0x2ad   :  { %v967_v50 = vpop.eup %966 }
 0x2ae   :  { %v398_v51 = vsel %vm120_vm1, %v967_v50, 0.0  ;;  %v969_v52 = vpop.eup %968 }
 0x2af   :  { %399 = vadd.xlane.f32.xlu0 %v398_v51  ;;  %v395_v53 = vsel %vm120_vm1, %v969_v52, 0.0 }
 0x2b3   :  { %396 = vadd.xlane.f32.xlu0 %v395_v53 }
 0x2ba   :  { %v263_v55 = vpop.xlane.xlu0 %262 }
 0x2bb   :  { %v265_v56 = vsub.f32 %v257_v42, %v263_v55  ;;  %v998_v42 = vmov 1  }
 0x2bc   :  { %964 = vset.pattern.permute.xlu1 %v998_v42  ;;  %965 = vset.pattern.permute.xlu0 %v998_v42 }
 0x2bd   :  { %v268_v57 = vmul.f32 1.442695, %v265_v56 }
 0x2bf   :  { %970 = vpow2.f32 %v268_v57 }
 0x2c0   :  { %972 = vpow2.f32 %v266_v61 }
 0x2c9   :  { %407 = vrot.lane.b32.xlu0 %v1061_v5, %s996_s1 }
 0x2cc   :  { %v971_v58 = vpop.eup %970 }
 0x2cd   :  { %v273_v59 = vsel %vm120_vm1, %v971_v58, 0.0  ;;  %v973_v62 = vpop.eup %972 }
 0x2ce   :  { %274 = vadd.xlane.f32.xlu1 %v273_v59  ;;  %v270_v63 = vsel %vm120_vm1, %v973_v62, 0.0 }
 0x2e8   :  { %271 = vadd.xlane.f32.xlu0 %v270_v63 }
 0x338   :  { %v400_v0 = vpop.xlane.xlu0 %399 }
 0x339   :  { %974 = vrcp.f32 %v400_v0 }
 0x33c   :  { %v397_v1 = vpop.xlane.xlu0 %396 }
 0x33d   :  { %976 = vrcp.f32 %v397_v1 }
 0x340   :  { %v408_v2 = vpop.permute.xlu0 %407 }
 0x341   :  { %929 = vmatprep.subr.mxu1 %v408_v2 }
 0x342   :  { %930 = vmatpush3.msra.mxu1 %v408_v2 }
 0x343   :  { %931 = vmatprep.subr.mxu1 %v406_v3 }
 0x344   :  { %932 = vmatpush3.msra.mxu1 %v406_v3 }
 0x345   :  { %943 = vmatprep.subr.msk.mxu1 %vm614_vm8, %v606_v22 }
 0x346   :  { %v975_v4 = vpop.eup %974 }
 0x347   :  { %v404_v7 = vmul.f32 %v975_v4, %v967_v50 }
 0x34a   :  { %v977_v5 = vpop.eup %976 }
 0x34b   :  { %v403_v6 = vmul.f32 %v977_v5, %v969_v52 }
 0x34d   :  { %933 = vmatprep.mubr.msk.f32.mxu1 %vm120_vm1, %v403_v6 }
 0x34e   :  { %934 = vmatmul.mubr.msk.f32.vlgmr.msra.gmra.mxu1 %vm120_vm1, %v404_v7 }
 0x34f   :  { %944 = vmatpush3.msk.msra.mxu1 %vm614_vm8, %v606_v22 }
 0x357   :  { %v275_v8 = vpop.xlane.xlu1 %274 }
 0x358   :  { %978 = vrcp.f32 %v275_v8 }
 0x365   :  { %v979_v10 = vpop.eup %978 }
 0x366   :  { %v279_v14 = vmul.f32 %v979_v10, %v971_v58 }
 0x371   :  { %v272_v9 = vpop.xlane.xlu0 %271 }
 0x372   :  { %980 = vrcp.f32 %v272_v9  ;;  %v881_v9 = vld [vmem:[%s1155_s7] ss:$0 sm:$0xff] }
 0x37f   :  { %v981_v11 = vpop.eup %980 }
 0x380   :  { %v278_v13 = vmul.f32 %v981_v11, %v973_v62 }
 0x382   :  { %926 = vmatprep.mubr.msk.f32.mxu0 %vm120_vm1, %v278_v13 }
 0x383   :  { %927 = vmatmul.mubr.msk.f32.vlgmr.msra.gmra.mxu0 %vm120_vm1, %v279_v14 }
 0x384   :  { %937 = vmatpush3.msra.mxu0 %v524_v15 }
 0x385   :  { %938 = vmatprep.subr.mxu0 %v523_v16 }
 0x386   :  { %939 = vmatpush3.msra.mxu0 %v523_v16 }
 0x40e   :  { %v935_v19 = vpop.f32.mrf.mxu1 }
 0x40f   :  { %496 = vrot.lane.b32.xlu1 %v935_v19, %s997_s20 }
 0x410   :  { %v483_v20 = vpop.f32.mrf.mxu1 }
 0x411   :  { %494 = vrot.lane.b32.xlu0 %v483_v20, %s997_s20 }
 0x443   :  { %v928_v23 = vpop.f32.mrf.mxu0 }
 0x445   :  { %v352_v27 = vpop.f32.mrf.mxu0 }
 0x481   :  { %v497_v25 = vpop.permute.xlu1 %496 }
 0x482   :  { %v501_v26 = vsel %vm36_vm0, %v928_v23, %v497_v25 }
 0x483   :  { %v510_v28 = vadd.f32 %v873_v24, %v501_v26  ;;  %v495_v29 = vpop.permute.xlu0 %494 }
 0x484   :  { %v500_v30 = vsel %vm36_vm0, %v352_v27, %v495_v29 }
 0x485   :  { %v514_v31 = vmin.f32 %v510_v28, 0.0  ;;  %v509_v32 = vadd.f32 %v873_v24, %v500_v30  ;;  %vm512_vm10 = vcmp.gt.f32.partialorder %v510_v28, 0.0 }
 0x487   :  { %v517_v33 = vmul.f32 1.442695, %v514_v31  ;;  %v513_v34 = vmin.f32 %v509_v32, 0.0  ;;  %vm511_vm9 = vcmp.gt.f32.partialorder %v509_v32, 0.0 }
 0x489   :  { %982 = vpow2.f32 %v517_v33  ;;  %v515_v35 = vmul.f32 1.442695, %v513_v34 }
 0x48b   :  { %984 = vpow2.f32 %v515_v35 }
 0x496   :  { %v983_v36 = vpop.eup %982 }
 0x497   :  { %v875_v38 = vadd.f32 -1.0, %v983_v36 }
 0x498   :  { %v985_v37 = vpop.eup %984 }
 0x499   :  { %v874_v39 = vadd.f32 -1.0, %v985_v37  ;;  %v522_v41 = vsel %vm512_vm10, %v510_v28, %v875_v38 }
 0x49b   :  { %v521_v40 = vsel %vm511_vm9, %v509_v32, %v874_v39 }
 0x49c   :  { %940 = vmatprep.mubr.msk.f32.mxu0 %vm120_vm1, %v521_v40 }
 0x49d   :  { %941 = vmatmul.mubr.msk.f32.vlgmr.msra.gmra.mxu0 %vm120_vm1, %v522_v41 }
 0x55d   :  { %v942_v43 = vpop.f32.mrf.mxu0 }
 0x55e   :  { %948 = vmatprep.subr.mxu0 %v942_v43 }
 0x55f   :  { %v597_v44 = vpop.f32.mrf.mxu0  ;;  %949 = vmatpush3.msra.mxu0 %v942_v43 }
 0x560   :  { %945 = vmatprep.mubr.msk.f32.mxu1 %vm607_vm11, %v597_v44  ;;  %950 = vmatprep.subr.mxu0 %v597_v44 }
 0x561   :  { %946 = vmatmul.mubr.msk.f32.vlgmr.msra.gmra.mxu1 %vm607_vm11, %v942_v43  ;;  %951 = vmatpush3.msra.mxu0 %v597_v44 }
 0x621   :  { %v947_v45 = vpop.f32.mrf.mxu1 }
 0x622   :  { %732 = vperm.xlu1 %964, %v947_v45  }
 0x623   :  { %v684_v46 = vpop.f32.mrf.mxu1 }
 0x624   :  { %727 = vperm.xlu0 %965, %v684_v46  }
 0x642   :  { %693 = vxpose.xlu0.b32.start [1/2] (short) (narrow) %v684_v46, 8 }
 0x646   :  { %694 = vxpose.xlu0.b32.end [2/2] (short) (narrow) %v947_v45, 8 }
 0x69d   :  { %v733_v50 = vpop.permute.xlu1 %732 }
 0x69f   :  { %v728_v47 = vpop.permute.xlu0 %727 }
 0x6be   :  { %v709_v48 = vpop.trf.xlu0 }
 0x6bf   :  { %v738_v49 = vrot.slane %v709_v48, %v246_v18 }
 0x6c1   :  { %v739_v51 = vadd.f32 %v738_v49, %v728_v47  ;;  %v740_v52 = vadd.f32 %v738_v49, %v733_v50 }
 0x6c3   :  { %vm742_vm12 = vcmp.gt.f32.partialorder %v740_v52, 0.0  ;;  %v744_v53 = vmul.f32 0.2, %v740_v52  ;;  %vm741_vm13 = vcmp.gt.f32.partialorder %v739_v51, 0.0  ;;  %v743_v54 = vmul.f32 0.2, %v739_v51 }
 0x6c5   :  { %v746_v55 = vsel %vm742_vm12, %v740_v52, %v744_v53  ;;  %v745_v56 = vsel %vm741_vm13, %v739_v51, %v743_v54 }
 0x6c6   :  { %v748_v57 = vsel %vm34_vm4, %v746_v55, -1e+30  ;;  %v747_v58 = vsel %vm33_vm2, %v745_v56, -1e+30 }
 0x6c7   :  { %v752_v59 = vsel %vm120_vm1, %v748_v57, -inf  ;;  %v749_v12 = vsel %vm120_vm1, %v747_v58, -inf }
 0x6c8   :  { %753 = vmax.xlane.f32.xlu0 %v752_v59  ;;  %750 = vmax.xlane.f32.xlu1 %v749_v12 }
 0x751   :  { %v754_v18 = vpop.xlane.xlu0 %753  ;;  %v751_v60 = vpop.xlane.xlu1 %750 }
 0x752   :  { %v756_v61 = vsub.f32 %v748_v57, %v754_v18  ;;  %v755_v62 = vsub.f32 %v747_v58, %v751_v60 }
 0x754   :  { %v757_v63 = vmul.f32 1.442695, %v755_v62  ;;  %v759_v0 = vmul.f32 1.442695, %v756_v61 }
 0x756   :  { %986 = vpow2.f32 %v757_v63 }
 0x757   :  { %988 = vpow2.f32 %v759_v0 }
 0x763   :  { %v987_v1 = vpop.eup %986 }
 0x764   :  { %v761_v21 = vsel %vm120_vm1, %v987_v1, 0.0  ;;  %v989_v2 = vpop.eup %988 }
 0x765   :  { %762 = vadd.xlane.f32.xlu1 %v761_v21  ;;  %v764_v17 = vsel %vm120_vm1, %v989_v2, 0.0 }
 0x769   :  { %765 = vadd.xlane.f32.xlu1 %v764_v17 }
 0x7ee   :  { %v763_v3 = vpop.xlane.xlu1 %762 }
 0x7ef   :  { %990 = vrcp.f32 %v763_v3 }
 0x7f2   :  { %v766_v4 = vpop.xlane.xlu1 %765 }
 0x7f3   :  { %992 = vrcp.f32 %v766_v4 }
 0x7fc   :  { %v991_v5 = vpop.eup %990 }
 0x7fd   :  { %v769_v6 = vmul.f32 %v991_v5, %v987_v1 }
 0x7ff   :  { %952 = vmatprep.mubr.msk.f32.mxu0 %vm120_vm1, %v769_v6 }
 0x800   :  { %v993_v7 = vpop.eup %992 }
 0x801   :  { %v770_v8 = vmul.f32 %v993_v7, %v989_v2 }
 0x803   :  { %953 = vmatmul.mubr.msk.f32.vlgmr.msra.gmra.mxu0 %vm120_vm1, %v770_v8 }
 0x8c3   :  { %v954_v10 = vpop.f32.mrf.mxu0 }
 0x8c4   :  { %v856_v11 = vadd.f32 %v954_v10, %v881_v9 }
 0x8c5   :  { %v850_v13 = vpop.f32.mrf.mxu0 }
 0x8c6   :  { %860 = vst.msk [vmem:[%s1156_s8 + $0x8] sm:$0xff] %vm607_vm11, %v856_v11  ;;  %v851_v14 = vadd.f32 %v881_v9, %v850_v13 }
 0x8c8   :  { %859 = vst.msk [vmem:[%s1156_s8] sm:$0xff] %vm607_vm11, %v851_v14 }

</bundles_post_ra>
